<compile_context>
chip_gen: v6e
topology: v6e:2x2x1
jax: 0.10.0
libtpu: 0.0.40
codegen_flags: <defaults>
</compile_context>

<pallas_src>
import jax
import jax.numpy as jnp
from jax import lax
from jax.experimental import pallas as pl
from jax.experimental.pallas import tpu as pltpu


def decoder_steps_kernel(emb_ref, h0_ref, c0_ref,
                         wg_ref, bg_ref, wl_ref, bl_ref,
                         out_ref, hc_ref,
                         h_scr, c_scr):
    """One LSTM decode step per grid iteration t (weights stay resident).

    emb_ref : (1, B, E)  bf16   embedded token for step t (dropout == identity)
    h0_ref  : (B, H)     f32    initial hidden state (read only at t == 0)
    c0_ref  : (B, H)     f32    initial cell state   (read only at t == 0)
    wg_ref  : (E+H, 4H)  bf16   fused [W_ih^T ; W_hh^T]
    bg_ref  : (1, 4H)    f32    b_ih + b_hh
    wl_ref  : (H, V)     bf16   output projection W^T
    bl_ref  : (1, V)     f32    output projection bias
    out_ref : (1, B, V)  f32    per-step log-softmax output
    hc_ref  : (B, 2H)    f32    packed final state [h | c] (lane-dense slab)
    h_scr   : (B, H)     f32    carried hidden state (VMEM scratch)
    c_scr   : (B, H)     f32    carried cell state   (VMEM scratch)
    """
    H = h0_ref.shape[1]
    t = pl.program_id(0)

    @pl.when(t == 0)
    def _():
        h_scr[...] = h0_ref[...]
        c_scr[...] = c0_ref[...]

    x = emb_ref[0]                                   # (B, E) bf16
    h_prev = h_scr[...]                              # (B, H) f32

    # Single fused MXU pass: [x | h_prev] @ [W_ih^T ; W_hh^T], f32 accumulate.
    x_cat = jnp.concatenate([x, h_prev.astype(jnp.bfloat16)], axis=1)
    gates = (jnp.dot(x_cat, wg_ref[...], preferred_element_type=jnp.float32)
             + bg_ref[...])                          # (B, 4H) f32

    # Full-width EUP passes, then lane-aligned slices (PyTorch gate order i,f,g,o).
    sig = jax.nn.sigmoid(gates)
    tng = jnp.tanh(gates)
    i_g = sig[:, 0 * H:1 * H]
    f_g = sig[:, 1 * H:2 * H]
    g_g = tng[:, 2 * H:3 * H]
    o_g = sig[:, 3 * H:4 * H]

    c_new = f_g * c_scr[...] + i_g * g_g
    h_new = o_g * jnp.tanh(c_new)

    # Output projection (bf16 operands, f32 accumulation) + stable log-softmax.
    logits = (jnp.dot(h_new.astype(jnp.bfloat16), wl_ref[...],
                      preferred_element_type=jnp.float32) + bl_ref[...])
    m = jnp.max(logits, axis=-1, keepdims=True)
    lse = m + jnp.log(jnp.sum(jnp.exp(logits - m), axis=-1, keepdims=True))
    out_ref[0] = logits - lse

    # Carry the recurrent state; the packed [h|c] slab has a constant output
    # block index, so its HBM writeback happens only once at the end.
    h_scr[...] = h_new
    c_scr[...] = c_new
    hc_ref[:, 0:H] = h_new
    hc_ref[:, H:2 * H] = c_new


def prepare_params(params):
    """One-time weight prep (hoisted out of the per-step path):
    transpose, concat gate weights, fuse biases, cast matmul operands to bf16."""
    w_gates = jnp.concatenate([jnp.transpose(params["w_ih"]),
                               jnp.transpose(params["w_hh"])], axis=0)  # (E+H, 4H)
    return {
        "emb_table": params["emb_table"],                               # (V, E) f32
        "w_gates": w_gates.astype(jnp.bfloat16),                        # (E+H, 4H) bf16
        "b_gates": (params["b_ih"] + params["b_hh"])[None, :],          # (1, 4H) f32
        "w_lin": jnp.transpose(params["w_lin"]).astype(jnp.bfloat16),   # (H, V) bf16
        "b_lin": params["b_lin"][None, :],                              # (1, V) f32
    }


def decoder_steps(token_ids_tb, h0, c0, prep):
    """Fused T-step (teacher-forced) decode in a single pallas_call.

    token_ids_tb : (T, B) int32
    h0, c0       : (B, H) f32
    returns      : (log_probs (T, B, V), h_T (B, H), c_T (B, H))
    """
    T, B = token_ids_tb.shape
    H = h0.shape[-1]
    V, E = prep["emb_table"].shape

    # Glue: embedding gather for all T steps at once; dropout = identity (eval).
    # NOTE: jnp.take clamps out-of-range ids (PyTorch Embedding would raise).
    emb_all = jnp.take(prep["emb_table"], token_ids_tb, axis=0).astype(jnp.bfloat16)

    grid_spec = pltpu.PrefetchScalarGridSpec(
        num_scalar_prefetch=0,
        grid=(T,),
        in_specs=[
            pl.BlockSpec((1, B, E), lambda t: (t, 0, 0)),      # per-step embedding
            pl.BlockSpec((B, H), lambda t: (0, 0)),            # h0 (resident)
            pl.BlockSpec((B, H), lambda t: (0, 0)),            # c0 (resident)
            pl.BlockSpec((E + H, 4 * H), lambda t: (0, 0)),    # fused gate weights
            pl.BlockSpec((1, 4 * H), lambda t: (0, 0)),        # fused gate bias
            pl.BlockSpec((H, V), lambda t: (0, 0)),            # projection weight
            pl.BlockSpec((1, V), lambda t: (0, 0)),            # projection bias
        ],
        out_specs=(
            pl.BlockSpec((1, B, V), lambda t: (t, 0, 0)),      # log-probs, step t
            pl.BlockSpec((B, 2 * H), lambda t: (0, 0)),        # packed [h | c]
        ),
        scratch_shapes=[pltpu.VMEM((B, H), jnp.float32),       # h carry
                        pltpu.VMEM((B, H), jnp.float32)],      # c carry
    )

    log_probs, hc = pl.pallas_call(
        decoder_steps_kernel,
        out_shape=(jax.ShapeDtypeStruct((T, B, V), jnp.float32),
                   jax.ShapeDtypeStruct((B, 2 * H), jnp.float32)),
        grid_spec=grid_spec,
        compiler_params=pltpu.CompilerParams(
            dimension_semantics=("arbitrary",)),               # t carries state
    )(emb_all, h0, c0, prep["w_gates"], prep["b_gates"],
      prep["w_lin"], prep["b_lin"])

    return log_probs, hc[:, :H], hc[:, H:]


def decoder_forward(token_ids, hidden, prep):
    """Exact `Decoder.forward` semantics (single step).

    token_ids : (B, 1) int32
    hidden    : (h0, c0), each (1, B, H)   (PyTorch LSTM hidden layout)
    returns   : (log_probs (B, V), (h1, c1) each (1, B, H))
    """
    h0, c0 = hidden
    log_probs, h1, c1 = decoder_steps(jnp.transpose(token_ids), h0[0], c0[0], prep)
    return log_probs[0], (h1[None, :, :], c1[None, :, :])


def decoder_steps_ref(token_ids_tb, h0, c0, prep):
    """Pure-JAX reference with the same precision policy (bf16 matmuls, f32 gates)."""
    H = h0.shape[-1]
    emb_table = prep["emb_table"]
    wg, bg = prep["w_gates"], prep["b_gates"]
    wl, bl = prep["w_lin"], prep["b_lin"]

    def step(carry, tok_b):
        h, c = carry
        x = jnp.take(emb_table, tok_b, axis=0).astype(jnp.bfloat16)
        x_cat = jnp.concatenate([x, h.astype(jnp.bfloat16)], axis=1)
        gates = jnp.dot(x_cat, wg, preferred_element_type=jnp.float32) + bg
        i_g = jax.nn.sigmoid(gates[:, 0 * H:1 * H])
        f_g = jax.nn.sigmoid(gates[:, 1 * H:2 * H])
        g_g = jnp.tanh(gates[:, 2 * H:3 * H])
        o_g = jax.nn.sigmoid(gates[:, 3 * H:4 * H])
        c_new = f_g * c + i_g * g_g
        h_new = o_g * jnp.tanh(c_new)
        logits = jnp.dot(h_new.astype(jnp.bfloat16), wl,
                         preferred_element_type=jnp.float32) + bl
        return (h_new, c_new), jax.nn.log_softmax(logits, axis=-1)

    (h_t, c_t), lps = lax.scan(step, (h0, c0), token_ids_tb)
    return lps, h_t, c_t


def init_params(key, emb_size, decoder_hidden_size, output_size):
    """Deterministic parameter init matching the module's __init__ shapes."""
    ks = jax.random.split(key, 7)
    E, H, V = emb_size, decoder_hidden_size, output_size
    k_lstm = 1.0 / jnp.sqrt(H)
    k_lin = 1.0 / jnp.sqrt(H)
    return {
        "emb_table": jax.random.normal(ks[0], (V, E), jnp.float32),
        "w_ih": jax.random.uniform(ks[1], (4 * H, E), jnp.float32, -k_lstm, k_lstm),
        "w_hh": jax.random.uniform(ks[2], (4 * H, H), jnp.float32, -k_lstm, k_lstm),
        "b_ih": jax.random.uniform(ks[3], (4 * H,), jnp.float32, -k_lstm, k_lstm),
        "b_hh": jax.random.uniform(ks[4], (4 * H,), jnp.float32, -k_lstm, k_lstm),
        "w_lin": jax.random.uniform(ks[5], (V, H), jnp.float32, -k_lin, k_lin),
        "b_lin": jax.random.uniform(ks[6], (V,), jnp.float32, -k_lin, k_lin),
    }


if __name__ == "__main__":
    # Small shapes, chosen lane/sublane-friendly per the perf review.
    B = 8          # batch: fills all 8 f32 sublanes
    EMB = 128      # emb_size (lane-aligned)
    ENC_H = 128    # encoder_hidden_size (unused in forward, kept for spec parity)
    DEC_H = 128    # decoder_hidden_size (lane-aligned gate slices)
    VOCAB = 512    # output_size
    T = 8          # fused decode steps demonstrated below

    key = jax.random.PRNGKey(0)
    k_params, k_tok, k_tok_seq, k_h, k_c = jax.random.split(key, 5)

    params = init_params(k_params, EMB, DEC_H, VOCAB)
    prep = prepare_params(params)          # one-time weight prep (hoisted)

    # ----- single-step call: exact Decoder.forward semantics -----------------
    token_ids = jax.random.randint(k_tok, (B, 1), 0, VOCAB, dtype=jnp.int32)
    h0 = jax.random.normal(k_h, (1, B, DEC_H), jnp.float32)
    c0 = jax.random.normal(k_c, (1, B, DEC_H), jnp.float32)

    log_probs, (h1, c1) = decoder_forward(token_ids, (h0, c0), prep)
    jax.block_until_ready((log_probs, h1, c1))

    ref_lp, ref_h, ref_c = decoder_steps_ref(
        jnp.transpose(token_ids), h0[0], c0[0], prep)

    assert log_probs.shape == (B, VOCAB)
    assert h1.shape == (1, B, DEC_H) and c1.shape == (1, B, DEC_H)
    assert jnp.allclose(jnp.exp(log_probs).sum(axis=-1), 1.0, atol=1e-4)
    assert jnp.allclose(log_probs, ref_lp[0], atol=5e-3, rtol=5e-3)
    assert jnp.allclose(h1[0], ref_h, atol=5e-3, rtol=5e-3)
    assert jnp.allclose(c1[0], ref_c, atol=5e-3, rtol=5e-3)

    # ----- fused multi-step decode: one pallas_call for T steps --------------
    tokens_tb = jax.random.randint(k_tok_seq, (T, B), 0, VOCAB, dtype=jnp.int32)
    lps, h_T, c_T = decoder_steps(tokens_tb, h0[0], c0[0], prep)
    jax.block_until_ready((lps, h_T, c_T))

    ref_lps, ref_hT, ref_cT = decoder_steps_ref(tokens_tb, h0[0], c0[0], prep)
    assert lps.shape == (T, B, VOCAB)
    assert jnp.allclose(jnp.exp(lps).sum(axis=-1), 1.0, atol=1e-4)
    assert jnp.allclose(lps, ref_lps, atol=5e-3, rtol=5e-3)
    assert jnp.allclose(h_T, ref_hT, atol=5e-3, rtol=5e-3)
    assert jnp.allclose(c_T, ref_cT, atol=5e-3, rtol=5e-3)

    print("KERNEL_OK")
</pallas_src>

<mosaic_0001>
module attributes {stable_mosaic.version = 11 : i64} {
  func.func @decoder_steps_kernel(%arg0: i32, %arg1: memref<1x8x128xbf16, #tpu.memory_space<vmem>>, %arg2: memref<8x128xf32, #tpu.memory_space<vmem>>, %arg3: memref<8x128xf32, #tpu.memory_space<vmem>>, %arg4: memref<256x512xbf16, #tpu.memory_space<vmem>>, %arg5: memref<1x512xf32, #tpu.memory_space<vmem>>, %arg6: memref<128x512xbf16, #tpu.memory_space<vmem>>, %arg7: memref<1x512xf32, #tpu.memory_space<vmem>>, %arg8: memref<1x8x512xf32, #tpu.memory_space<vmem>>, %arg9: memref<8x256xf32, #tpu.memory_space<vmem>>, %arg10: memref<8x128xf32, #tpu.memory_space<vmem>>, %arg11: memref<8x128xf32, #tpu.memory_space<vmem>>) attributes {dimension_semantics = [#tpu.dimension_semantics<arbitrary>], iteration_bounds = array<i64: 1>, scalar_prefetch = 0 : i64, scratch_operands = 2 : i64, tpu.core_type = #tpu.core_type<tc>, window_params = [{transform_indices = @transform_0, window_bounds = array<i64: 1, 8, 128>}, {pipeline_mode = #tpu.pipeline_mode<synchronous>, transform_indices = @transform_1, window_bounds = array<i64: 8, 128>}, {pipeline_mode = #tpu.pipeline_mode<synchronous>, transform_indices = @transform_2, window_bounds = array<i64: 8, 128>}, {pipeline_mode = #tpu.pipeline_mode<synchronous>, transform_indices = @transform_3, window_bounds = array<i64: 256, 512>}, {pipeline_mode = #tpu.pipeline_mode<synchronous>, transform_indices = @transform_4, window_bounds = array<i64: 1, 512>}, {pipeline_mode = #tpu.pipeline_mode<synchronous>, transform_indices = @transform_5, window_bounds = array<i64: 128, 512>}, {pipeline_mode = #tpu.pipeline_mode<synchronous>, transform_indices = @transform_6, window_bounds = array<i64: 1, 512>}, {transform_indices = @transform_7, window_bounds = array<i64: 1, 8, 512>}, {pipeline_mode = #tpu.pipeline_mode<synchronous>, transform_indices = @transform_8, window_bounds = array<i64: 8, 256>}]} {
    %c0_i32 = arith.constant 0 : i32
    %0 = arith.cmpi eq, %arg0, %c0_i32 : i32
    %1 = arith.extui %0 : i1 to i32
    %c0_i32_0 = arith.constant 0 : i32
    %2 = arith.cmpi ne, %1, %c0_i32_0 : i32
    scf.if %2 {
      %c0_29 = arith.constant 0 : index
      %c0_30 = arith.constant 0 : index
      %53 = vector.load %arg2[%c0_29, %c0_30] : memref<8x128xf32, #tpu.memory_space<vmem>>, vector<8x128xf32>
      %c0_31 = arith.constant 0 : index
      %c0_32 = arith.constant 0 : index
      %54 = vector.load %arg10[%c0_31, %c0_32] : memref<8x128xf32, #tpu.memory_space<vmem>>, vector<8x128xf32>
      tpu.vector_store %arg10[%c0_31, %c0_32], %53 {strides = array<i32>} : memref<8x128xf32, #tpu.memory_space<vmem>>, vector<8x128xf32>,
      %c0_33 = arith.constant 0 : index
      %c0_34 = arith.constant 0 : index
      %55 = vector.load %arg3[%c0_33, %c0_34] : memref<8x128xf32, #tpu.memory_space<vmem>>, vector<8x128xf32>
      %c0_35 = arith.constant 0 : index
      %c0_36 = arith.constant 0 : index
      %56 = vector.load %arg11[%c0_35, %c0_36] : memref<8x128xf32, #tpu.memory_space<vmem>>, vector<8x128xf32>
      tpu.vector_store %arg11[%c0_35, %c0_36], %55 {strides = array<i32>} : memref<8x128xf32, #tpu.memory_space<vmem>>, vector<8x128xf32>,
    } else {
    }
    %c0 = arith.constant 0 : index
    %c0_1 = arith.constant 0 : index
    %c0_2 = arith.constant 0 : index
    %3 = vector.load %arg1[%c0, %c0_1, %c0_2] : memref<1x8x128xbf16, #tpu.memory_space<vmem>>, vector<1x8x128xbf16>
    %4 = vector.shape_cast %3 : vector<1x8x128xbf16> to vector<8x128xbf16>
    %c0_3 = arith.constant 0 : index
    %c0_4 = arith.constant 0 : index
    %5 = vector.load %arg10[%c0_3, %c0_4] : memref<8x128xf32, #tpu.memory_space<vmem>>, vector<8x128xf32>
    %6 = arith.truncf %5 : vector<8x128xf32> to vector<8x128xbf16>
    %7 = tpu.concatenate %4, %6 in 1 : vector<8x128xbf16>, vector<8x128xbf16> -> vector<8x256xbf16>
    %c0_5 = arith.constant 0 : index
    %c0_6 = arith.constant 0 : index
    %8 = vector.load %arg4[%c0_5, %c0_6] : memref<256x512xbf16, #tpu.memory_space<vmem>>, vector<256x512xbf16>
    %cst = arith.constant dense<0.000000e+00> : vector<8x512xf32>
    %9 = tpu.matmul %7, %8, %cst {dimension_numbers = #tpu.dot_dimension_numbers<[1], [0], [0], [1], [0, 0, 1, 1], [], []>} : vector<8x256xbf16>, vector<256x512xbf16>, vector<8x512xf32> -> vector<8x512xf32>
    %c0_7 = arith.constant 0 : index
    %c0_8 = arith.constant 0 : index
    %10 = vector.load %arg5[%c0_7, %c0_8] : memref<1x512xf32, #tpu.memory_space<vmem>>, vector<1x512xf32>
    %11 = vector.broadcast %10 : vector<1x512xf32> to vector<8x512xf32>
    %12 = arith.addf %9, %11 : vector<8x512xf32>
    %13 = arith.negf %12 : vector<8x512xf32>
    %14 = math.exp %13 : vector<8x512xf32>
    %cst_9 = arith.constant 1.000000e+00 : f32
    %15 = vector.broadcast %cst_9 : f32 to vector<8x512xf32>
    %16 = arith.addf %15, %14 : vector<8x512xf32>
    %17 = arith.divf %15, %16 : vector<8x512xf32>
    %18 = math.tanh %12 : vector<8x512xf32>
    %19 = vector.extract_strided_slice %17 {offsets = [0, 0], sizes = [8, 128], strides = [1, 1]} : vector<8x512xf32> to vector<8x128xf32>
    %20 = vector.extract_strided_slice %17 {offsets = [0, 128], sizes = [8, 128], strides = [1, 1]} : vector<8x512xf32> to vector<8x128xf32>
    %21 = vector.extract_strided_slice %18 {offsets = [0, 256], sizes = [8, 128], strides = [1, 1]} : vector<8x512xf32> to vector<8x128xf32>
    %22 = vector.extract_strided_slice %17 {offsets = [0, 384], sizes = [8, 128], strides = [1, 1]} : vector<8x512xf32> to vector<8x128xf32>
    %c0_10 = arith.constant 0 : index
    %c0_11 = arith.constant 0 : index
    %23 = vector.load %arg11[%c0_10, %c0_11] : memref<8x128xf32, #tpu.memory_space<vmem>>, vector<8x128xf32>
    %24 = arith.mulf %20, %23 : vector<8x128xf32>
    %25 = arith.mulf %19, %21 : vector<8x128xf32>
    %26 = arith.addf %24, %25 : vector<8x128xf32>
    %27 = math.tanh %26 : vector<8x128xf32>
    %28 = arith.mulf %22, %27 : vector<8x128xf32>
    %29 = arith.truncf %28 : vector<8x128xf32> to vector<8x128xbf16>
    %c0_12 = arith.constant 0 : index
    %c0_13 = arith.constant 0 : index
    %30 = vector.load %arg6[%c0_12, %c0_13] : memref<128x512xbf16, #tpu.memory_space<vmem>>, vector<128x512xbf16>
    %cst_14 = arith.constant dense<0.000000e+00> : vector<8x512xf32>
    %31 = tpu.matmul %29, %30, %cst_14 {dimension_numbers = #tpu.dot_dimension_numbers<[1], [0], [0], [1], [0, 0, 1, 1], [], []>} : vector<8x128xbf16>, vector<128x512xbf16>, vector<8x512xf32> -> vector<8x512xf32>
    %c0_15 = arith.constant 0 : index
    %c0_16 = arith.constant 0 : index
    %32 = vector.load %arg7[%c0_15, %c0_16] : memref<1x512xf32, #tpu.memory_space<vmem>>, vector<1x512xf32>
    %33 = vector.broadcast %32 : vector<1x512xf32> to vector<8x512xf32>
    %34 = arith.addf %31, %33 : vector<8x512xf32>
    %cst_17 = arith.constant dense<0xFF800000> : vector<8xf32>
    %35 = vector.multi_reduction <maximumf>, %34, %cst_17 [1] : vector<8x512xf32> to vector<8xf32>
    %36 = vector.shape_cast %35 : vector<8xf32> to vector<8x1xf32>
    %37 = vector.broadcast %36 : vector<8x1xf32> to vector<8x512xf32>
    %38 = arith.subf %34, %37 : vector<8x512xf32>
    %39 = math.exp %38 : vector<8x512xf32>
    %cst_18 = arith.constant dense<0.000000e+00> : vector<8xf32>
    %40 = vector.multi_reduction <add>, %39, %cst_18 [1] : vector<8x512xf32> to vector<8xf32>
    %41 = vector.shape_cast %40 : vector<8xf32> to vector<8x1xf32>
    %42 = math.log %41 : vector<8x1xf32>
    %43 = arith.addf %36, %42 : vector<8x1xf32>
    %44 = vector.broadcast %43 : vector<8x1xf32> to vector<8x512xf32>
    %45 = arith.subf %34, %44 : vector<8x512xf32>
    %c0_19 = arith.constant 0 : index
    %c0_20 = arith.constant 0 : index
    %c0_21 = arith.constant 0 : index
    %46 = vector.load %arg8[%c0_19, %c0_20, %c0_21] : memref<1x8x512xf32, #tpu.memory_space<vmem>>, vector<1x8x512xf32>
    %47 = vector.shape_cast %46 : vector<1x8x512xf32> to vector<8x512xf32>
    %48 = vector.shape_cast %45 : vector<8x512xf32> to vector<1x8x512xf32>
    tpu.vector_store %arg8[%c0_19, %c0_20, %c0_21], %48 {strides = array<i32>} : memref<1x8x512xf32, #tpu.memory_space<vmem>>, vector<1x8x512xf32>,
    %c0_22 = arith.constant 0 : index
    %c0_23 = arith.constant 0 : index
    %49 = vector.load %arg10[%c0_22, %c0_23] : memref<8x128xf32, #tpu.memory_space<vmem>>, vector<8x128xf32>
    tpu.vector_store %arg10[%c0_22, %c0_23], %28 {strides = array<i32>} : memref<8x128xf32, #tpu.memory_space<vmem>>, vector<8x128xf32>,
    %c0_24 = arith.constant 0 : index
    %c0_25 = arith.constant 0 : index
    %50 = vector.load %arg11[%c0_24, %c0_25] : memref<8x128xf32, #tpu.memory_space<vmem>>, vector<8x128xf32>
    tpu.vector_store %arg11[%c0_24, %c0_25], %26 {strides = array<i32>} : memref<8x128xf32, #tpu.memory_space<vmem>>, vector<8x128xf32>,
    %c0_26 = arith.constant 0 : index
    %c0_27 = arith.constant 0 : index
    %51 = vector.load %arg9[%c0_26, %c0_27] : memref<8x256xf32, #tpu.memory_space<vmem>>, vector<8x128xf32>
    tpu.vector_store %arg9[%c0_26, %c0_27], %28 {strides = array<i32>} : memref<8x256xf32, #tpu.memory_space<vmem>>, vector<8x128xf32>,
    %c0_28 = arith.constant 0 : index
    %c128 = arith.constant 128 : index
    %52 = vector.load %arg9[%c0_28, %c128] : memref<8x256xf32, #tpu.memory_space<vmem>>, vector<8x128xf32>
    tpu.vector_store %arg9[%c0_28, %c128], %26 {strides = array<i32>} : memref<8x256xf32, #tpu.memory_space<vmem>>, vector<8x128xf32>,
    return
  }
  func.func @transform_0(%arg0: i32) -> (i32, i32, i32) {
    %c0_i32 = arith.constant 0 : i32
    %c0_i32_0 = arith.constant 0 : i32
    %c0_i32_1 = arith.constant 0 : i32
    return %arg0, %c0_i32, %c0_i32_0 : i32, i32, i32
  }
  func.func @transform_1(%arg0: i32) -> (i32, i32) {
    %c0_i32 = arith.constant 0 : i32
    %c0_i32_0 = arith.constant 0 : i32
    %c0_i32_1 = arith.constant 0 : i32
    return %c0_i32, %c0_i32_0 : i32, i32
  }
  func.func @transform_2(%arg0: i32) -> (i32, i32) {
    %c0_i32 = arith.constant 0 : i32
    %c0_i32_0 = arith.constant 0 : i32
    %c0_i32_1 = arith.constant 0 : i32
    return %c0_i32, %c0_i32_0 : i32, i32
  }
  func.func @transform_3(%arg0: i32) -> (i32, i32) {
    %c0_i32 = arith.constant 0 : i32
    %c0_i32_0 = arith.constant 0 : i32
    %c0_i32_1 = arith.constant 0 : i32
    return %c0_i32, %c0_i32_0 : i32, i32
  }
  func.func @transform_4(%arg0: i32) -> (i32, i32) {
    %c0_i32 = arith.constant 0 : i32
    %c0_i32_0 = arith.constant 0 : i32
    %c0_i32_1 = arith.constant 0 : i32
    return %c0_i32, %c0_i32_0 : i32, i32
  }
  func.func @transform_5(%arg0: i32) -> (i32, i32) {
    %c0_i32 = arith.constant 0 : i32
    %c0_i32_0 = arith.constant 0 : i32
    %c0_i32_1 = arith.constant 0 : i32
    return %c0_i32, %c0_i32_0 : i32, i32
  }
  func.func @transform_6(%arg0: i32) -> (i32, i32) {
    %c0_i32 = arith.constant 0 : i32
    %c0_i32_0 = arith.constant 0 : i32
    %c0_i32_1 = arith.constant 0 : i32
    return %c0_i32, %c0_i32_0 : i32, i32
  }
  func.func @transform_7(%arg0: i32) -> (i32, i32, i32) {
    %c0_i32 = arith.constant 0 : i32
    %c0_i32_0 = arith.constant 0 : i32
    %c0_i32_1 = arith.constant 0 : i32
    return %arg0, %c0_i32, %c0_i32_0 : i32, i32, i32
  }
  func.func @transform_8(%arg0: i32) -> (i32, i32) {
    %c0_i32 = arith.constant 0 : i32
    %c0_i32_0 = arith.constant 0 : i32
    %c0_i32_1 = arith.constant 0 : i32
    return %c0_i32, %c0_i32_0 : i32, i32
  }
}

</mosaic_0001>

<bundles_post_ra>
// kernel: tpu_custom_call.1
= control target key start
LH: loop header
LB: loop body
LE: loop exit
PB: predicated region body
PF: predicated region fallthrough
CT: control target
= control target key end

     0   :  { %14 = vsyncpa [#allocation5], 0  ;;  %s1499_s0 = inlined_call_operand.hbm [shape: bf16[1,8,128], index: 0, kind: input, shape index: {}]   ;;  %s1500_s1 = inlined_call_operand.hbm [shape: f32[8,128], index: 1, kind: input, shape index: {}]   ;;  %s1501_s2 = inlined_call_operand.hbm [shape: f32[8,128], index: 2, kind: input, shape index: {}]   ;;  %s1502_s3 = inlined_call_operand.hbm [shape: bf16[256,512], index: 3, kind: input, shape index: {}]   ;;  %s1503_s4 = inlined_call_operand.vmem [shape: f32[1,512], index: 4, kind: input, shape index: {}]   ;;  %s1504_s5 = inlined_call_operand.hbm [shape: bf16[128,512], index: 5, kind: input, shape index: {}]   ;;  %s1505_s6 = inlined_call_operand.vmem [shape: f32[1,512], index: 6, kind: input, shape index: {}]   ;;  %s1506_s7 = inlined_call_operand.hbm [shape: f32[1,8,512], index: 7, kind: output, shape index: {0}]   ;;  %s1507_s8 = inlined_call_operand.hbm [shape: f32[8,256], index: 8, kind: output, shape index: {1}]  }
   0x1   :  { %15 = vsyncpa [#allocation8], 0 }
   0x2   :  { %16 = vsyncpa [#allocation11], 0 }
   0x3   :  { %17 = vsyncpa [#allocation6], 0 }
   0x4   :  { %18 = vsyncpa [#allocation15], 0  ;;  %s1411_s27 = smov [#allocation7]   ;;  %s1412_s29 = smov [#allocation10]  }
   0x5   :  { %s35_s28 = sshll.u32 %s1411_s27, 4  ;;  %s54_s30 = sshll.u32 %s1412_s29, 4  ;;  %s36_s28 = int_to_ptr.vmem [resolvable:$true] %s35_s28  ;;  %s55_s30 = int_to_ptr.vmem [resolvable:$true] %s54_s30 }
   0x6   :  { %s1269_s9 = scalar_lea.vmem %s36_s28, 128  ;;  %p1274_p1 = scmp.lt.s32.totalorder %s36_s28, %s36_s28 }
   0x7   :  { %p1270_p0 = scmp.ne.s32.totalorder %s36_s28, %s1269_s9  ;;  %p1275_p2 = scmp.lt.s32.totalorder %s1269_s9, %s1269_s9 }
   0x9   :  { %p1276_p3 = por %p1275_p2, %p1274_p1 }
   0xb   :  { %p1277_p4 = pnand %p1276_p3, %p1270_p0 }
   0xd   :  { %1280 = shalt.err (!%p1277_p4)
}
   0xe   :  { %38 = dma.hbm_to_vmem [thread:$0]  %s1500_s1, 128, %s36_s28, [#allocation8]  }
   0xf   :  { %s1289_s12 = scalar_lea.vmem %s55_s30, 8192  ;;  %p1294_p6 = scmp.lt.s32.totalorder %s55_s30, %s55_s30 }
  0x10   :  { %p1290_p5 = scmp.ne.s32.totalorder %s55_s30, %s1289_s12  ;;  %p1295_p7 = scmp.lt.s32.totalorder %s1289_s12, %s1289_s12 }
  0x12   :  { %p1296_p8 = por %p1295_p7, %p1294_p6 }
  0x14   :  { %p1297_p9 = pnand %p1296_p8, %p1290_p5 }
  0x16   :  { %1300 = shalt.err (!%p1297_p9)
}
  0x17   :  { %s1413_s13 = smov 256   ;;  %s1414_s14 = smov 16  }
  0x18   :  { %60 = dma.hbm_to_vmem [thread:$0]  %s1502_s3, 8192, %s55_s30, [#allocation11], %s1413_s13, %s1413_s13, %s1414_s14  }
  0x19   :  { %s1415_s17 = smov [#allocation4]   ;;  %s1416_s19 = smov [#allocation9]  }
  0x1a   :  { %s25_s18 = sshll.u32 %s1415_s17, 4  ;;  %s45_s1 = sshll.u32 %s1416_s19, 4  ;;  %s26_s18 = int_to_ptr.vmem [resolvable:$true] %s25_s18  ;;  %s46_s1 = int_to_ptr.vmem [resolvable:$true] %s45_s1 }
  0x1b   :  { %s1309_s20 = scalar_lea.vmem %s26_s18, 64  ;;  %p1314_p11 = scmp.lt.s32.totalorder %s26_s18, %s26_s18 }
  0x1c   :  { %p1310_p10 = scmp.ne.s32.totalorder %s26_s18, %s1309_s20  ;;  %p1315_p12 = scmp.lt.s32.totalorder %s1309_s20, %s1309_s20 }
  0x1e   :  { %p1316_p13 = por %p1315_p12, %p1314_p11 }
  0x20   :  { %p1317_p0 = pnand %p1316_p13, %p1310_p10 }
  0x22   :  { %1320 = shalt.err (!%p1317_p0)
}
  0x23   :  { %28 = dma.hbm_to_vmem [thread:$0]  %s1499_s0, 64, %s26_s18, [#allocation5]  }
  0x24   :  { %s1329_s23 = scalar_lea.vmem %s46_s1, 128  ;;  %p1334_p2 = scmp.lt.s32.totalorder %s46_s1, %s46_s1 }
  0x25   :  { %p1330_p1 = scmp.ne.s32.totalorder %s46_s1, %s1329_s23  ;;  %p1335_p3 = scmp.lt.s32.totalorder %s1329_s23, %s1329_s23 }
  0x27   :  { %p1336_p4 = por %p1335_p3, %p1334_p2 }
  0x29   :  { %p1337_p5 = pnand %p1336_p4, %p1330_p1 }
  0x2b   :  { %1340 = shalt.err (!%p1337_p5)
}
  0x2c   :  { %48 = dma.hbm_to_vmem [thread:$0]  %s1501_s2, 128, %s46_s1, [#allocation8]  }
  0x2d   :  { %s1417_s25 = smov [#allocation12]  }
  0x2e   :  { %s68_s26 = sshll.u32 %s1417_s25, 4  ;;  %s69_s26 = int_to_ptr.vmem [resolvable:$true] %s68_s26 }
  0x2f   :  { %s1349_s27 = scalar_lea.vmem %s69_s26, 4096  ;;  %p1354_p7 = scmp.lt.s32.totalorder %s69_s26, %s69_s26 }
  0x30   :  { %p1350_p6 = scmp.ne.s32.totalorder %s69_s26, %s1349_s27  ;;  %p1355_p8 = scmp.lt.s32.totalorder %s1349_s27, %s1349_s27 }
  0x32   :  { %p1356_p9 = por %p1355_p8, %p1354_p7 }
  0x34   :  { %p1357_p10 = pnand %p1356_p9, %p1350_p6 }
  0x36   :  { %1360 = shalt.err (!%p1357_p10)
}
  0x37   :  { %74 = dma.hbm_to_vmem [thread:$0]  %s1504_s5, 4096, %s69_s26, [#allocation11], %s1413_s13, %s1413_s13, %s1414_s14  }
  0x38   :  { %1401 = dma.done.wait [#allocation5], 64  }
  0x39   :  { %1402 = vsyncadd [#allocation5], 4294967232 }
  0x3a   :  { %1403 = dma.done.wait [#allocation8], 256  }
  0x3b   :  { %1404 = vsyncadd [#allocation8], 4294967040 }
  0x3c   :  { %1405 = dma.done.wait [#allocation11], 12288  }
  0x3d   :  { %1406 = vsyncadd [#allocation11], 4294955008  ;;  %v1091_v0 = vld [vmem:[#allocation10 + $0xe4] ss:$16 sps:$4 sm:$0xff]   ;;  %v1093_v1 = vld [vmem:[#allocation10 + $0xe0] ss:$16 sps:$4 sm:$0xff]  }
  0x3e   :  { %510 = vmatprep.subr.bf16.mxu0 %v1091_v0  ;;  %v1094_v2 = vld [vmem:[#allocation10 + $0xc4] ss:$16 sps:$4 sm:$0xff]   ;;  %v1096_v3 = vld [vmem:[#allocation10 + $0xc0] ss:$16 sps:$4 sm:$0xff]   ;;  %v1102_v5 = vld [vmem:[#allocation10 + $0xec] ss:$16 sps:$4 sm:$0xff]  }
  0x3f   :  { %511 = vmatpush1.bf16.msra.mxu0 %v1093_v1  ;;  %v1097_v4 = vld [vmem:[#allocation10 + $0xa4] ss:$16 sps:$4 sm:$0xff]   ;;  %v1105_v6 = vld [vmem:[#allocation10 + $0xe8] ss:$16 sps:$4 sm:$0xff]   ;;  %v1099_v7 = vld [vmem:[#allocation10 + $0xa0] ss:$16 sps:$4 sm:$0xff]   ;;  %551 = vmatprep.subr.bf16.mxu1 %v1102_v5 }
  0x40   :  { %512 = vmatprep.subr.bf16.mxu0 %v1094_v2  ;;  %v1100_v8 = vld [vmem:[#allocation10 + $0x84] ss:$16 sps:$4 sm:$0xff]   ;;  %552 = vmatpush1.bf16.msra.mxu1 %v1105_v6  ;;  %v1108_v9 = vld [vmem:[#allocation10 + $0xcc] ss:$16 sps:$4 sm:$0xff]   ;;  %v1111_v10 = vld [vmem:[#allocation10 + $0xc8] ss:$16 sps:$4 sm:$0xff]  }
  0x41   :  { %553 = vmatprep.subr.bf16.mxu1 %v1108_v9  ;;  %v1104_v11 = vld [vmem:[#allocation10 + $0x80] ss:$16 sps:$4 sm:$0xff]   ;;  %v1106_v12 = vld [vmem:[#allocation10 + $0x64] ss:$16 sps:$4 sm:$0xff]   ;;  %v1114_v13 = vld [vmem:[#allocation10 + $0xac] ss:$16 sps:$4 sm:$0xff]  }
  0x42   :  { %v1117_v14 = vld [vmem:[#allocation10 + $0xa8] ss:$16 sps:$4 sm:$0xff]   ;;  %v1120_v15 = vld [vmem:[#allocation10 + $0x8c] ss:$16 sps:$4 sm:$0xff]   ;;  %v1110_v16 = vld [vmem:[#allocation10 + $0x60] ss:$16 sps:$4 sm:$0xff]  }
  0x43   :  { %513 = vmatpush1.bf16.msra.mxu0 %v1096_v3  ;;  %v1112_v17 = vld [vmem:[#allocation10 + $0x44] ss:$16 sps:$4 sm:$0xff]   ;;  %v1123_v18 = vld [vmem:[#allocation10 + $0x88] ss:$16 sps:$4 sm:$0xff]   ;;  %v1126_v19 = vld [vmem:[#allocation10 + $0x6c] ss:$16 sps:$4 sm:$0xff]  }
  0x44   :  { %514 = vmatprep.subr.bf16.mxu0 %v1097_v4  ;;  %554 = vmatpush1.bf16.msra.mxu1 %v1111_v10  ;;  %v1116_v20 = vld [vmem:[#allocation10 + $0x40] ss:$16 sps:$4 sm:$0xff]   ;;  %v1118_v21 = vld [vmem:[#allocation10 + $0x24] ss:$16 sps:$4 sm:$0xff]   ;;  %v1129_v22 = vld [vmem:[#allocation10 + $0x68] ss:$16 sps:$4 sm:$0xff]  }
  0x45   :  { %555 = vmatprep.subr.bf16.mxu1 %v1114_v13  ;;  %v1132_v23 = vld [vmem:[#allocation10 + $0x4c] ss:$16 sps:$4 sm:$0xff]   ;;  %v1122_v24 = vld [vmem:[#allocation10 + $0x20] ss:$16 sps:$4 sm:$0xff]   ;;  %v1124_v25 = vld [vmem:[#allocation10 + $0x4] ss:$16 sps:$4 sm:$0xff]  }
  0x46   :  { %v1135_v26 = vld [vmem:[#allocation10 + $0x48] ss:$16 sps:$4 sm:$0xff]   ;;  %v1138_v27 = vld [vmem:[#allocation10 + $0x2c] ss:$16 sps:$4 sm:$0xff]   ;;  %v1128_v28 = vld [vmem:[#allocation10] ss:$16 sps:$4 sm:$0xff]  }
  0x47   :  { %515 = vmatpush1.bf16.msra.mxu0 %v1099_v7  ;;  %v1130_v29 = vld [vmem:[#allocation10 + $0x1e4] ss:$16 sps:$4 sm:$0xff]   ;;  %v1141_v30 = vld [vmem:[#allocation10 + $0x28] ss:$16 sps:$4 sm:$0xff]   ;;  %v1144_v31 = vld [vmem:[#allocation10 + $0xc] ss:$16 sps:$4 sm:$0xff]  }
  0x48   :  { %516 = vmatprep.subr.bf16.mxu0 %v1100_v8  ;;  %556 = vmatpush1.bf16.msra.mxu1 %v1117_v14  ;;  %v1134_v32 = vld [vmem:[#allocation10 + $0x1e0] ss:$16 sps:$4 sm:$0xff]   ;;  %v1136_v33 = vld [vmem:[#allocation10 + $0x1c4] ss:$16 sps:$4 sm:$0xff]   ;;  %v1147_v34 = vld [vmem:[#allocation10 + $0x8] ss:$16 sps:$4 sm:$0xff]  }
  0x49   :  { %557 = vmatprep.subr.bf16.mxu1 %v1120_v15  ;;  %v1150_v35 = vld [vmem:[#allocation10 + $0x1ec] ss:$16 sps:$4 sm:$0xff]   ;;  %v1140_v36 = vld [vmem:[#allocation10 + $0x1c0] ss:$16 sps:$4 sm:$0xff]   ;;  %v1142_v37 = vld [vmem:[#allocation10 + $0x1a4] ss:$16 sps:$4 sm:$0xff]  }
  0x4a   :  { %v1153_v38 = vld [vmem:[#allocation10 + $0x1e8] ss:$16 sps:$4 sm:$0xff]   ;;  %v1156_v39 = vld [vmem:[#allocation10 + $0x1cc] ss:$16 sps:$4 sm:$0xff]   ;;  %v97_v40 = vld [vmem:[#allocation7] sm:$0xff] }
  0x4b   :  { %517 = vmatpush1.bf16.msra.mxu0 %v1104_v11  ;;  %v1146_v41 = vld [vmem:[#allocation10 + $0x1a0] ss:$16 sps:$4 sm:$0xff]   ;;  %v103_v42 = vpack.c.bf16 %v97_v40, %v97_v40  ;;  %v1148_v43 = vld [vmem:[#allocation10 + $0x184] ss:$16 sps:$4 sm:$0xff]   ;;  %v1159_v44 = vld [vmem:[#allocation10 + $0x1c8] ss:$16 sps:$4 sm:$0xff]  }
  0x4c   :  { %518 = vmatprep.subr.bf16.mxu0 %v1106_v12  ;;  %558 = vmatpush1.bf16.msra.mxu1 %v1123_v18  ;;  %v1152_v45 = vld [vmem:[#allocation10 + $0x180] ss:$16 sps:$4 sm:$0xff]   ;;  %v1162_v46 = vld [vmem:[#allocation10 + $0x1ac] ss:$16 sps:$4 sm:$0xff]   ;;  %v1154_v47 = vld [vmem:[#allocation10 + $0x164] ss:$16 sps:$4 sm:$0xff]  }
  0x4d   :  { %559 = vmatprep.subr.bf16.mxu1 %v1126_v19  ;;  %542 = vmatprep.mubr.bf16.mxu0 %v103_v42  ;;  %v1165_v48 = vld [vmem:[#allocation10 + $0x1a8] ss:$16 sps:$4 sm:$0xff]   ;;  %v1168_v49 = vld [vmem:[#allocation10 + $0x18c] ss:$16 sps:$4 sm:$0xff]   ;;  %v1158_v50 = vld [vmem:[#allocation10 + $0x160] ss:$16 sps:$4 sm:$0xff]  }
  0x4e   :  { %583 = vmatprep.mubr.bf16.mxu1 %v103_v42  ;;  %v1160_v51 = vld [vmem:[#allocation10 + $0x144] ss:$16 sps:$4 sm:$0xff]   ;;  %v1171_v52 = vld [vmem:[#allocation10 + $0x188] ss:$16 sps:$4 sm:$0xff]   ;;  %v1174_v53 = vld [vmem:[#allocation10 + $0x16c] ss:$16 sps:$4 sm:$0xff]  }
  0x4f   :  { %519 = vmatpush1.bf16.msra.mxu0 %v1110_v16  ;;  %v1164_v54 = vld [vmem:[#allocation10 + $0x140] ss:$16 sps:$4 sm:$0xff]   ;;  %v1166_v55 = vld [vmem:[#allocation10 + $0x124] ss:$16 sps:$4 sm:$0xff]   ;;  %v1177_v56 = vld [vmem:[#allocation10 + $0x168] ss:$16 sps:$4 sm:$0xff]  }
  0x50   :  { %520 = vmatprep.subr.bf16.mxu0 %v1112_v17  ;;  %560 = vmatpush1.bf16.msra.mxu1 %v1129_v22  ;;  %v1178_v57 = vld [vmem:[#allocation10 + $0x14c] ss:$16 sps:$4 sm:$0xff]   ;;  %v1170_v58 = vld [vmem:[#allocation10 + $0x120] ss:$16 sps:$4 sm:$0xff]   ;;  %v1172_v59 = vld [vmem:[#allocation10 + $0x104] ss:$16 sps:$4 sm:$0xff]  }
  0x51   :  { %561 = vmatprep.subr.bf16.mxu1 %v1132_v23  ;;  %v1180_v60 = vld [vmem:[#allocation10 + $0x148] ss:$16 sps:$4 sm:$0xff]   ;;  %v1181_v61 = vld [vmem:[#allocation10 + $0x12c] ss:$16 sps:$4 sm:$0xff]   ;;  %v1176_v62 = vld [vmem:[#allocation10 + $0x100] ss:$16 sps:$4 sm:$0xff]  }
  0x52   :  { %v1183_v63 = vld [vmem:[#allocation10 + $0x128] ss:$16 sps:$4 sm:$0xff]   ;;  %v1184_v0 = vld [vmem:[#allocation10 + $0x10c] ss:$16 sps:$4 sm:$0xff]   ;;  %v1189_v3 = vld [vmem:[#allocation12 + $0xe4] ss:$16 sps:$4 sm:$0xff]  }
  0x53   :  { %521 = vmatpush1.bf16.msra.mxu0 %v1116_v20  ;;  %v101_v1 = vld [vmem:[#allocation4] sm:$0xf]  ;;  %v1186_v2 = vld [vmem:[#allocation10 + $0x108] ss:$16 sps:$4 sm:$0xff]   ;;  %v1187_v5 = vld [vmem:[#allocation12 + $0xe0] ss:$16 sps:$4 sm:$0xff]  }
  0x54   :  { %522 = vmatprep.subr.bf16.mxu0 %v1118_v21  ;;  %562 = vmatpush1.bf16.msra.mxu1 %v1135_v26  ;;  %v1192_v4 = vld [vmem:[#allocation12 + $0xec] ss:$16 sps:$4 sm:$0xff]   ;;  %v1190_v6 = vld [vmem:[#allocation12 + $0xe8] ss:$16 sps:$4 sm:$0xff]   ;;  %v1195_v7 = vld [vmem:[#allocation12 + $0xc4] ss:$16 sps:$4 sm:$0xff]  }
  0x55   :  { %563 = vmatprep.subr.bf16.mxu1 %v1138_v27  ;;  %v1198_v8 = vld [vmem:[#allocation12 + $0xcc] ss:$16 sps:$4 sm:$0xff]   ;;  %v1193_v9 = vld [vmem:[#allocation12 + $0xc0] ss:$16 sps:$4 sm:$0xff]   ;;  %v1196_v10 = vld [vmem:[#allocation12 + $0xc8] ss:$16 sps:$4 sm:$0xff]  }
  0x56   :  { %v1201_v11 = vld [vmem:[#allocation12 + $0xa4] ss:$16 sps:$4 sm:$0xff]   ;;  %v1204_v12 = vld [vmem:[#allocation12 + $0xac] ss:$16 sps:$4 sm:$0xff]   ;;  %v1199_v13 = vld [vmem:[#allocation12 + $0xa0] ss:$16 sps:$4 sm:$0xff]  }
  0x57   :  { %523 = vmatpush1.bf16.msra.mxu0 %v1122_v24  ;;  %v1202_v14 = vld [vmem:[#allocation12 + $0xa8] ss:$16 sps:$4 sm:$0xff]   ;;  %v1207_v15 = vld [vmem:[#allocation12 + $0x84] ss:$16 sps:$4 sm:$0xff]   ;;  %v1210_v16 = vld [vmem:[#allocation12 + $0x8c] ss:$16 sps:$4 sm:$0xff]  }
  0x58   :  { %524 = vmatprep.subr.bf16.mxu0 %v1124_v25  ;;  %564 = vmatpush1.bf16.msra.mxu1 %v1141_v30  ;;  %v1205_v17 = vld [vmem:[#allocation12 + $0x80] ss:$16 sps:$4 sm:$0xff]   ;;  %v1208_v18 = vld [vmem:[#allocation12 + $0x88] ss:$16 sps:$4 sm:$0xff]   ;;  %v1213_v20 = vld [vmem:[#allocation12 + $0x64] ss:$16 sps:$4 sm:$0xff]  }
  0x59   :  { %565 = vmatprep.subr.bf16.mxu1 %v1144_v31  ;;  %v1211_v19 = vld [vmem:[#allocation12 + $0x60] ss:$16 sps:$4 sm:$0xff]   ;;  %v1214_v21 = vld [vmem:[#allocation12 + $0x68] ss:$16 sps:$4 sm:$0xff]   ;;  %v1216_v22 = vld [vmem:[#allocation12 + $0x6c] ss:$16 sps:$4 sm:$0xff]  }
  0x5a   :  { %v1219_v23 = vld [vmem:[#allocation12 + $0x44] ss:$16 sps:$4 sm:$0xff]   ;;  %v1222_v24 = vld [vmem:[#allocation12 + $0x4c] ss:$16 sps:$4 sm:$0xff]   ;;  %v1217_v25 = vld [vmem:[#allocation12 + $0x40] ss:$16 sps:$4 sm:$0xff]  }
  0x5b   :  { %525 = vmatpush1.bf16.msra.mxu0 %v1128_v28  ;;  %v1220_v26 = vld [vmem:[#allocation12 + $0x48] ss:$16 sps:$4 sm:$0xff]   ;;  %v1225_v27 = vld [vmem:[#allocation12 + $0x24] ss:$16 sps:$4 sm:$0xff]   ;;  %v1228_v28 = vld [vmem:[#allocation12 + $0x2c] ss:$16 sps:$4 sm:$0xff]  }
  0x5c   :  { %526 = vmatprep.subr.bf16.mxu0 %v1130_v29  ;;  %566 = vmatpush1.bf16.msra.mxu1 %v1147_v34  ;;  %v1418_v29 = vmov 0   ;;  %v1223_v30 = vld [vmem:[#allocation12 + $0x20] ss:$16 sps:$4 sm:$0xff]   ;;  %v1226_v31 = vld [vmem:[#allocation12 + $0x28] ss:$16 sps:$4 sm:$0xff]  }
  0x5d   :  { %567 = vmatprep.subr.bf16.mxu1 %v1150_v35  ;;  %v1229_v34 = vld [vmem:[#allocation12] ss:$16 sps:$4 sm:$0xff]   ;;  %v1232_v35 = vld [vmem:[#allocation12 + $0x8] ss:$16 sps:$4 sm:$0xff]  }
  0x5f   :  { %527 = vmatpush2.bf16.msra.mxu0 %v1134_v32  ;;  %v1231_v32 = vld [vmem:[#allocation12 + $0x4] ss:$16 sps:$4 sm:$0xff]  }
  0x60   :  { %528 = vmatprep.subr.bf16.mxu0 %v1136_v33  ;;  %568 = vmatpush2.bf16.msra.mxu1 %v1153_v38  ;;  %v1234_v33 = vld [vmem:[#allocation12 + $0xc] ss:$16 sps:$4 sm:$0xff]  }
  0x61   :  { %569 = vmatprep.subr.bf16.mxu1 %v1156_v39  ;;  %v168_v39 = vld [vmem:[%s1503_s4] sm:$0xf] }
  0x63   :  { %529 = vmatpush2.bf16.msra.mxu0 %v1140_v36  ;;  %v170_v36 = vlaneseq }
  0x64   :  { %530 = vmatprep.subr.bf16.mxu0 %v1142_v37  ;;  %570 = vmatpush2.bf16.msra.mxu1 %v1159_v44 }
  0x65   :  { %571 = vmatprep.subr.bf16.mxu1 %v1162_v46  ;;  %v171_v37 = vshrl.u32 %v170_v36, 7 }
  0x67   :  { %531 = vmatpush2.bf16.msra.mxu0 %v1146_v41  ;;  %v172_v38 = vsub.s32 0, %v171_v37  ;;  %v176_v40 = vsub.s32 1, %v171_v37 }
  0x68   :  { %532 = vmatprep.subr.bf16.mxu0 %v1148_v43  ;;  %572 = vmatpush2.bf16.msra.mxu1 %v1165_v48 }
  0x69   :  { %573 = vmatprep.subr.bf16.mxu1 %v1168_v49  ;;  %v173_v41 = vrot.slane %v168_v39, %v172_v38  ;;  %v177_v42 = vrot.slane %v168_v39, %v176_v40  ;;  %v184_v49 = vsub.s32 3, %v171_v37 }
  0x6b   :  { %533 = vmatpush2.bf16.msra.mxu0 %v1152_v45 }
  0x6c   :  { %534 = vmatprep.subr.bf16.mxu0 %v1154_v47  ;;  %574 = vmatpush2.bf16.msra.mxu1 %v1171_v52 }
  0x6d   :  { %575 = vmatprep.subr.bf16.mxu1 %v1174_v53  ;;  %v180_v53 = vsub.s32 2, %v171_v37 }
  0x6f   :  { %535 = vmatpush2.bf16.msra.mxu0 %v1158_v50 }
  0x70   :  { %536 = vmatprep.subr.bf16.mxu0 %v1160_v51  ;;  %576 = vmatpush2.bf16.msra.mxu1 %v1177_v56 }
  0x71   :  { %577 = vmatprep.subr.bf16.mxu1 %v1178_v57  ;;  %v181_v57 = vrot.slane %v168_v39, %v180_v53 }
  0x73   :  { %537 = vmatpush2.bf16.msra.mxu0 %v1164_v54 }
  0x74   :  { %538 = vmatprep.subr.bf16.mxu0 %v1166_v55  ;;  %578 = vmatpush2.bf16.msra.mxu1 %v1180_v60  ;;  %v185_v55 = vrot.slane %v168_v39, %v184_v49 }
  0x75   :  { %579 = vmatprep.subr.bf16.mxu1 %v1181_v61 }
  0x77   :  { %539 = vmatpush2.bf16.msra.mxu0 %v1170_v58 }
  0x78   :  { %540 = vmatprep.subr.bf16.mxu0 %v1172_v59  ;;  %580 = vmatpush2.bf16.msra.mxu1 %v1183_v63 }
  0x79   :  { %581 = vmatprep.subr.bf16.mxu1 %v1184_v0 }
  0x7b   :  { %541 = vmatpush2.bf16.msra.mxu0 %v1176_v62 }
  0x7c   :  { %582 = vmatpush2.bf16.msra.mxu1 %v1186_v2  ;;  %832 = vmatprep.subr.bf16.mxu0 %v1189_v3 }
  0x7d   :  { %873 = vmatprep.subr.bf16.mxu1 %v1192_v4 }
  0x7e   :  { %543 = vmatmul.mubr.bf16.vlgmr.msra.gmra.mxu0 %v101_v1 }
  0x7f   :  { %584 = vmatmul.mubr.bf16.vlgmr.msra.gmra.mxu1 %v101_v1  ;;  %833 = vmatpush1.bf16.msra.mxu0 %v1187_v5  ;;  %v99_v5 = vld [vmem:[#allocation9] sm:$0xff] }
  0x80   :  { %874 = vmatpush1.bf16.msra.mxu1 %v1190_v6  ;;  %834 = vmatprep.subr.bf16.mxu0 %v1195_v7 }
  0x81   :  { %875 = vmatprep.subr.bf16.mxu1 %v1198_v8  ;;  %864 = vmatprep.mubr.bf16.mxu0 %v1418_v29 }
  0x82   :  { %905 = vmatprep.mubr.bf16.mxu1 %v1418_v29 }
  0x83   :  { %835 = vmatpush1.bf16.msra.mxu0 %v1193_v9 }
  0x84   :  { %876 = vmatpush1.bf16.msra.mxu1 %v1196_v10  ;;  %836 = vmatprep.subr.bf16.mxu0 %v1201_v11 }
  0x85   :  { %877 = vmatprep.subr.bf16.mxu1 %v1204_v12 }
  0x87   :  { %837 = vmatpush1.bf16.msra.mxu0 %v1199_v13 }
  0x88   :  { %878 = vmatpush1.bf16.msra.mxu1 %v1202_v14  ;;  %838 = vmatprep.subr.bf16.mxu0 %v1207_v15  ;;  %v650_v15 = vld [vmem:[%s1505_s6] sm:$0xf]  ;;  %s1419_s6 = smov [#allocation14]  }
  0x89   :  { %879 = vmatprep.subr.bf16.mxu1 %v1210_v16  ;;  %v655_v16 = vrot.slane %v650_v15, %v172_v38  ;;  %s967_s30 = sshll.u32 %s1419_s6, 4  ;;  %s968_s30 = int_to_ptr.vmem [resolvable:$true] %s967_s30 }
  0x8a   :  { %s1361_s9 = scalar_lea.vmem %s968_s30, 256  ;;  %p1366_p12 = scmp.lt.s32.totalorder %s968_s30, %s968_s30 }
  0x8b   :  { %839 = vmatpush1.bf16.msra.mxu0 %v1205_v17  ;;  %v663_v17 = vrot.slane %v650_v15, %v180_v53  ;;  %p1362_p11 = scmp.ne.s32.totalorder %s968_s30, %s1361_s9  ;;  %p1367_p13 = scmp.lt.s32.totalorder %s1361_s9, %s1361_s9 }
  0x8c   :  { %880 = vmatpush1.bf16.msra.mxu1 %v1208_v18  ;;  %840 = vmatprep.subr.bf16.mxu0 %v1213_v20  ;;  %v659_v18 = vrot.slane %v650_v15, %v176_v40 }
  0x8d   :  { %881 = vmatprep.subr.bf16.mxu1 %v1216_v22  ;;  %p1368_p0 = por %p1367_p13, %p1366_p12 }
  0x8f   :  { %841 = vmatpush1.bf16.msra.mxu0 %v1211_v19  ;;  %v667_v19 = vrot.slane %v650_v15, %v184_v49  ;;  %p1369_p1 = pnand %p1368_p0, %p1362_p11 }
  0x90   :  { %882 = vmatpush1.bf16.msra.mxu1 %v1214_v21  ;;  %842 = vmatprep.subr.bf16.mxu0 %v1219_v23 }
  0x91   :  { %883 = vmatprep.subr.bf16.mxu1 %v1222_v24 }
  0x93   :  { %843 = vmatpush1.bf16.msra.mxu0 %v1217_v25 }
  0x94   :  { %884 = vmatpush1.bf16.msra.mxu1 %v1220_v26  ;;  %844 = vmatprep.subr.bf16.mxu0 %v1225_v27 }
  0x95   :  { %885 = vmatprep.subr.bf16.mxu1 %v1228_v28 }
  0x97   :  { %845 = vmatpush1.bf16.msra.mxu0 %v1223_v30 }
  0x98   :  { %886 = vmatpush1.bf16.msra.mxu1 %v1226_v31  ;;  %846 = vmatprep.subr.bf16.mxu0 %v1231_v32 }
  0x99   :  { %887 = vmatprep.subr.bf16.mxu1 %v1234_v33 }
  0x9b   :  { %847 = vmatpush1.bf16.msra.mxu0 %v1229_v34 }
  0x9c   :  { %888 = vmatpush1.bf16.msra.mxu1 %v1232_v35 }
 0x13e   :  { %v544_v43 = vpop.f32.mrf.mxu0 }
 0x13f   :  { %v545_v44 = vadd.f32 %v544_v43, %v173_v41  ;;  %v585_v51 = vpop.f32.mrf.mxu1 }
 0x140   :  { %v546_v45 = vpop.f32.mrf.mxu0  ;;  %v586_v60 = vadd.f32 %v585_v51, %v181_v57 }
 0x141   :  { %v1046_v46 = vmul.f32 -1.442695, %v545_v44  ;;  %v547_v47 = vadd.f32 %v546_v45, %v177_v42  ;;  %v587_v54 = vpop.f32.mrf.mxu1 }
 0x142   :  { %v548_v48 = vpop.f32.mrf.mxu0  ;;  %v588_v59 = vadd.f32 %v587_v54, %v185_v55 }
 0x143   :  { %1235 = vpow2.f32 %v1046_v46  ;;  %v1047_v50 = vmul.f32 -1.442695, %v547_v47  ;;  %v589_v56 = vpop.f32.mrf.mxu1 }
 0x144   :  { %v549_v52 = vpop.f32.mrf.mxu0  ;;  %v1048_v61 = vmul.f32 -1.442695, %v588_v59 }
 0x145   :  { %1237 = vpow2.f32 %v1047_v50  ;;  %v590_v58 = vpop.f32.mrf.mxu1 }
 0x146   :  { %1239 = vtanh.f32 %v586_v60 }
 0x147   :  { %1241 = vpow2.f32 %v1048_v61 }
 0x150   :  { %v1236_v62 = vpop.eup %1235 }
 0x151   :  { %v601_v63 = vadd.f32 1.0, %v1236_v62 }
 0x152   :  { %v1238_v0 = vpop.eup %1237 }
 0x153   :  { %1243 = vrcp.f32 %v601_v63  ;;  %v602_v1 = vadd.f32 1.0, %v1238_v0  ;;  %v1240_v2 = vpop.eup %1239 }
 0x154   :  { %v1242_v3 = vpop.eup %1241 }
 0x155   :  { %1245 = vrcp.f32 %v602_v1  ;;  %v603_v7 = vadd.f32 1.0, %v1242_v3 }
 0x157   :  { %1247 = vrcp.f32 %v603_v7 }
 0x160   :  { %v1244_v4 = vpop.eup %1243 }
 0x161   :  { %v613_v9 = vmul.f32 %v1244_v4, %v1240_v2 }
 0x162   :  { %v1246_v6 = vpop.eup %1245 }
 0x163   :  { %v612_v8 = vmul.f32 %v1246_v6, %v99_v5 }
 0x164   :  { %v1248_v11 = vpop.eup %1247 }
 0x165   :  { %v614_v10 = vadd.f32 %v613_v9, %v612_v8 }
 0x167   :  { %1249 = vtanh.f32 %v614_v10  ;;  %950 = vst [vmem:[#allocation14 + $0x8] sm:$0xff] %v614_v10 }
 0x174   :  { %v1250_v12 = vpop.eup %1249 }
 0x175   :  { %v616_v13 = vmul.f32 %v1250_v12, %v1248_v11 }
 0x177   :  { %v617_v14 = vpack.c.bf16 %v616_v13, %v616_v13  ;;  %949 = vst [vmem:[#allocation14] sm:$0xff] %v616_v13 }
 0x179   :  { %865 = vmatmul.mubr.bf16.vlgmr.msra.gmra.mxu0 %v617_v14  ;;  %906 = vmatmul.mubr.bf16.vlgmr.msra.gmra.mxu1 %v617_v14 }
 0x239   :  { %v866_v20 = vpop.f32.mrf.mxu0  ;;  %v907_v21 = vpop.f32.mrf.mxu1 }
 0x23a   :  { %v867_v24 = vadd.f32 %v866_v20, %v655_v16  ;;  %v908_v25 = vadd.f32 %v907_v21, %v663_v17 }
 0x23b   :  { %v868_v22 = vpop.f32.mrf.mxu0  ;;  %v909_v23 = vpop.f32.mrf.mxu1 }
 0x23c   :  { %v869_v26 = vadd.f32 %v868_v22, %v659_v18  ;;  %v910_v27 = vadd.f32 %v909_v23, %v667_v19 }
 0x23d   :  { %v870_v28 = vpop.f32.mrf.mxu0  ;;  %v911_v29 = vpop.f32.mrf.mxu1 }
 0x23e   :  { %v914_v30 = vmax.f32 %v867_v24, %v869_v26  ;;  %v915_v31 = vmax.f32 %v908_v25, %v910_v27 }
 0x23f   :  { %v871_v32 = vpop.f32.mrf.mxu0  ;;  %v912_v33 = vpop.f32.mrf.mxu1 }
 0x240   :  { %v916_v34 = vmax.f32 %v914_v30, %v915_v31 }
 0x242   :  { %917 = vmax.xlane.f32.xlu0 %v916_v34 }
 0x2cb   :  { %v918_v35 = vpop.xlane.xlu0 %917 }
 0x2cc   :  { %v919_v36 = vsub.f32 %v867_v24, %v918_v35  ;;  %v920_v37 = vsub.f32 %v869_v26, %v918_v35  ;;  %v921_v38 = vsub.f32 %v908_v25, %v918_v35  ;;  %v922_v39 = vsub.f32 %v910_v27, %v918_v35 }
 0x2ce   :  { %v923_v40 = vmul.f32 1.442695, %v919_v36  ;;  %v925_v41 = vmul.f32 1.442695, %v920_v37  ;;  %v927_v42 = vmul.f32 1.442695, %v921_v38 }
 0x2cf   :  { %v929_v43 = vmul.f32 1.442695, %v922_v39 }
 0x2d0   :  { %1251 = vpow2.f32 %v923_v40 }
 0x2d1   :  { %1253 = vpow2.f32 %v925_v41 }
 0x2d2   :  { %1255 = vpow2.f32 %v927_v42 }
 0x2d3   :  { %1257 = vpow2.f32 %v929_v43 }
 0x2dd   :  { %v1252_v44 = vpop.eup %1251 }
 0x2de   :  { %v1254_v45 = vpop.eup %1253 }
 0x2df   :  { %v931_v46 = vadd.f32 %v1254_v45, %v1252_v44  ;;  %v1256_v47 = vpop.eup %1255 }
 0x2e0   :  { %v1258_v49 = vpop.eup %1257 }
 0x2e1   :  { %v932_v48 = vadd.f32 %v1256_v47, %v931_v46 }
 0x2e3   :  { %v933_v50 = vadd.f32 %v1258_v49, %v932_v48 }
 0x2e5   :  { %934 = vadd.xlane.f32.xlu0 %v933_v50 }
 0x2e6   :  { %1372 = shalt.err (!%p1369_p1)
}
 0x2e7   :  { %970 = dma.vmem_to_hbm [thread:$0]  %s968_s30, 256, %s1507_s8, [#allocation15]  }
 0x2e8   :  { %s1420_s12 = smov [#allocation13]  }
 0x2e9   :  { %s957_s13 = sshll.u32 %s1420_s12, 4  ;;  %s958_s13 = int_to_ptr.vmem [resolvable:$true] %s957_s13 }
 0x2ea   :  { %s1381_s14 = scalar_lea.vmem %s958_s13, 512  ;;  %p1386_p3 = scmp.lt.s32.totalorder %s958_s13, %s958_s13 }
 0x2eb   :  { %p1382_p2 = scmp.ne.s32.totalorder %s958_s13, %s1381_s14  ;;  %p1387_p4 = scmp.lt.s32.totalorder %s1381_s14, %s1381_s14 }
 0x2ed   :  { %p1388_p5 = por %p1387_p4, %p1386_p3 }
 0x2ef   :  { %p1389_p6 = pnand %p1388_p5, %p1382_p2 }
 0x36e   :  { %v935_v51 = vpop.xlane.xlu0 %934 }
 0x36f   :  { %1259 = vlog2.f32 %v935_v51 }
 0x37c   :  { %v1260_v52 = vpop.eup %1259 }
 0x37d   :  { %v937_v53 = vmul.f32 0.6931472, %v1260_v52 }
 0x37f   :  { %v938_v54 = vadd.f32 %v937_v53, %v918_v35 }
 0x381   :  { %v939_v55 = vsub.f32 %v867_v24, %v938_v54  ;;  %v940_v56 = vsub.f32 %v869_v26, %v938_v54  ;;  %v941_v57 = vsub.f32 %v908_v25, %v938_v54  ;;  %v942_v58 = vsub.f32 %v910_v27, %v938_v54 }
 0x383   :  { %943 = vst [vmem:[#allocation13] sm:$0xff] %v939_v55  ;;  %944 = vst [vmem:[#allocation13 + $0x8] sm:$0xff] %v940_v56 }
 0x384   :  { %945 = vst [vmem:[#allocation13 + $0x10] sm:$0xff] %v941_v57  ;;  %946 = vst [vmem:[#allocation13 + $0x18] sm:$0xff] %v942_v58 }
 0x385   :  { %1392 = shalt.err (!%p1389_p6)
}
 0x386   :  { %960 = dma.vmem_to_hbm [thread:$0]  %s958_s13, 512, %s1506_s7, [#allocation6]  }
 0x387   :  { %1407 = dma.done.wait [#allocation6], 512  }
 0x388   :  { %1408 = vsyncadd [#allocation6], 4294966784 }
 0x389   :  { %1409 = dma.done.wait [#allocation15], 256  }
 0x38a   :  { %1410 = vsyncadd [#allocation15], 4294967040 }
 0x38b   :  { %977 = vsyncpa [#allocation5], 1 }
 0x38c   :  { %978 = vsyncpa [#allocation8], 1 }
 0x38d   :  { %979 = vsyncpa [#allocation11], 1 }
 0x38e   :  { %980 = vsyncpa [#allocation6], 1 }
 0x38f   :  { %981 = vsyncpa [#allocation15], 1 }

</bundles_post_ra>
